<compile_context>
chip_gen: v7x
topology: tpu7x:2x2x1
jax: 0.10.0
libtpu: 0.0.40
codegen_flags: <defaults>
</compile_context>

<pallas_src>
import functools

import jax
import jax.numpy as jnp
from jax.experimental import pallas as pl
from jax.experimental.pallas import tpu as pltpu


def _critic_kernel(state_ref, action_ref, w1s_ref, w1a_ref, b1_ref,
                   w2_ref, b2_ref, w3_ref, b3_ref, o_ref, *, reduce_out):
    # Layer 1 with the concat fused away:
    #   cat([s, a], 1) @ W1 == s @ W1[:S] + a @ W1[S:]
    h1 = jnp.dot(state_ref[...], w1s_ref[...], preferred_element_type=jnp.float32)
    h1 = h1 + jnp.dot(action_ref[...], w1a_ref[...],
                      preferred_element_type=jnp.float32)
    h1 = jnp.maximum(h1 + b1_ref[...], 0.0)

    # Layer 2
    h2 = jnp.dot(h1, w2_ref[...], preferred_element_type=jnp.float32)
    h2 = jnp.maximum(h2 + b2_ref[...], 0.0)

    # Layer 3
    if reduce_out:
        # output_size == 1: VPU multiply + lane reduce instead of a 1-wide MXU
        # pass; w3_ref is a lane-dense (1, H) row, b3 is a scalar in SMEM.
        out = jnp.sum(h2 * w3_ref[...], axis=-1, keepdims=True) + b3_ref[0]
    else:
        out = jnp.dot(h2, w3_ref[...],
                      preferred_element_type=jnp.float32) + b3_ref[...]
    o_ref[...] = out.astype(o_ref.dtype)


def critic_forward(state, action, params, *, batch_tile=256):
    """Pallas-backed forward pass of the Critic MLP."""
    w1, b1, w2, b2, w3, b3 = params
    B, S = state.shape
    A = action.shape[1]
    H = w1.shape[1]
    O = w3.shape[1]

    # Fuse the concat into the kernel: split W1 along its input dimension.
    # (Weight-only slices: tiny, one-time, constant-foldable under jit.)
    w1_s = w1[:S]
    w1_a = w1[S:]

    reduce_out = (O == 1)
    if reduce_out:
        w3_in = w3.reshape(1, H)            # lane-dense row for the VPU path
        b3_in = b3.reshape(1)               # 1-D scalar in SMEM (no padding blowup)
        w3_spec = pl.BlockSpec((1, H), lambda i: (0, 0))
        b3_spec = pl.BlockSpec(memory_space=pltpu.MemorySpace.SMEM)
    else:
        w3_in = w3
        b3_in = b3
        w3_spec = pl.BlockSpec((H, O), lambda i: (0, 0))
        b3_spec = pl.BlockSpec((1, O), lambda i: (0, 0))

    # Batch grid: weights/biases map to block (0, 0) every step (resident in
    # VMEM), activation/output tiles are pipelined over the batch.
    tm = B if B <= batch_tile else batch_tile
    grid = (pl.cdiv(B, tm),)

    cost = pl.CostEstimate(
        flops=2 * B * ((S + A) * H + H * H + H * O),
        transcendentals=0,
        bytes_accessed=4 * (B * (S + A) + (S + A) * H + H + H * H + H
                            + H * O + O + B * O),
    )

    kernel = functools.partial(_critic_kernel, reduce_out=reduce_out)

    return pl.pallas_call(
        kernel,
        out_shape=jax.ShapeDtypeStruct((B, O), jnp.float32),
        grid=grid,
        in_specs=[
            pl.BlockSpec((tm, S), lambda i: (i, 0)),   # state   (batch-tiled)
            pl.BlockSpec((tm, A), lambda i: (i, 0)),   # action  (batch-tiled)
            pl.BlockSpec((S, H), lambda i: (0, 0)),    # W1[:S]  (resident)
            pl.BlockSpec((A, H), lambda i: (0, 0)),    # W1[S:]  (resident)
            pl.BlockSpec((1, H), lambda i: (0, 0)),    # b1
            pl.BlockSpec((H, H), lambda i: (0, 0)),    # W2
            pl.BlockSpec((1, H), lambda i: (0, 0)),    # b2
            w3_spec,                                   # W3 (row or matrix)
            b3_spec,                                   # b3 (SMEM scalar or VMEM)
        ],
        out_specs=pl.BlockSpec((tm, O), lambda i: (i, 0)),
        compiler_params=pltpu.CompilerParams(
            dimension_semantics=("parallel",)),        # v7x: 2 TCs split batch
        cost_estimate=cost,
    )(state, action, w1_s, w1_a, b1, w2, b2, w3_in, b3_in)


def init_critic_params(key, input_size, hidden_size, output_size):
    """Deterministic synthetic parameters (PyTorch-style uniform init)."""
    ks = jax.random.split(key, 6)

    def linear(kw, kb, fan_in, fan_out):
        bound = 1.0 / jnp.sqrt(fan_in)
        # stored as (in, out) == W_pt.T
        w = jax.random.uniform(kw, (fan_in, fan_out), jnp.float32, -bound, bound)
        b = jax.random.uniform(kb, (1, fan_out), jnp.float32, -bound, bound)
        return w, b

    w1, b1 = linear(ks[0], ks[1], input_size, hidden_size)
    w2, b2 = linear(ks[2], ks[3], hidden_size, hidden_size)
    w3, b3 = linear(ks[4], ks[5], hidden_size, output_size)
    return (w1, b1, w2, b2, w3, b3)


def critic_reference(state, action, params):
    """Plain-JAX reference for correctness checking."""
    w1, b1, w2, b2, w3, b3 = params
    x = jnp.concatenate([state, action], axis=1)
    x = jax.nn.relu(x @ w1 + b1)
    x = jax.nn.relu(x @ w2 + b2)
    return x @ w3 + b3


if __name__ == "__main__":
    # Small shapes consistent with a TD3 walker critic; B=8 fills the sublanes.
    batch = 8
    state_dim, action_dim = 24, 8
    input_size = state_dim + action_dim
    hidden_size = 32
    output_size = 1

    key = jax.random.PRNGKey(0)
    k_state, k_action, k_params = jax.random.split(key, 3)
    state = jax.random.normal(k_state, (batch, state_dim), jnp.float32)
    action = jax.random.normal(k_action, (batch, action_dim), jnp.float32)
    params = init_critic_params(k_params, input_size, hidden_size, output_size)

    out = critic_forward(state, action, params)
    out = jax.block_until_ready(out)

    ref = critic_reference(state, action, params)
    assert out.shape == (batch, output_size)
    assert jnp.allclose(out, ref, atol=1e-4, rtol=1e-4), "mismatch vs reference"

    print("KERNEL_OK")
</pallas_src>

<mosaic_0001>
module attributes {stable_mosaic.version = 11 : i64} {
  func.func @_critic_kernel(%arg0: i32, %arg1: memref<8x24xf32, #tpu.memory_space<vmem>>, %arg2: memref<8x8xf32, #tpu.memory_space<vmem>>, %arg3: memref<24x32xf32, #tpu.memory_space<vmem>>, %arg4: memref<8x32xf32, #tpu.memory_space<vmem>>, %arg5: memref<1x32xf32, #tpu.memory_space<vmem>>, %arg6: memref<32x32xf32, #tpu.memory_space<vmem>>, %arg7: memref<1x32xf32, #tpu.memory_space<vmem>>, %arg8: memref<1x32xf32, #tpu.memory_space<vmem>>, %arg9: memref<1xf32, #tpu.memory_space<smem>>, %arg10: memref<8x1xf32, #tpu.memory_space<vmem>>) attributes {dimension_semantics = [#tpu.dimension_semantics<parallel>], iteration_bounds = array<i64: 1>, scalar_prefetch = 0 : i64, scratch_operands = 0 : i64, tpu.core_type = #tpu.core_type<tc>, window_params = [{transform_indices = @transform_0, window_bounds = array<i64: 8, 24>}, {transform_indices = @transform_1, window_bounds = array<i64: 8, 8>}, {pipeline_mode = #tpu.pipeline_mode<synchronous>, transform_indices = @transform_2, window_bounds = array<i64: 24, 32>}, {pipeline_mode = #tpu.pipeline_mode<synchronous>, transform_indices = @transform_3, window_bounds = array<i64: 8, 32>}, {pipeline_mode = #tpu.pipeline_mode<synchronous>, transform_indices = @transform_4, window_bounds = array<i64: 1, 32>}, {pipeline_mode = #tpu.pipeline_mode<synchronous>, transform_indices = @transform_5, window_bounds = array<i64: 32, 32>}, {pipeline_mode = #tpu.pipeline_mode<synchronous>, transform_indices = @transform_6, window_bounds = array<i64: 1, 32>}, {pipeline_mode = #tpu.pipeline_mode<synchronous>, transform_indices = @transform_7, window_bounds = array<i64: 1, 32>}, {transform_indices = @transform_8, window_bounds = array<i64: 1>}, {transform_indices = @transform_9, window_bounds = array<i64: 8, 1>}]} {
    %c0 = arith.constant 0 : index
    %c0_0 = arith.constant 0 : index
    %0 = vector.load %arg1[%c0, %c0_0] : memref<8x24xf32, #tpu.memory_space<vmem>>, vector<8x24xf32>
    %c0_1 = arith.constant 0 : index
    %c0_2 = arith.constant 0 : index
    %1 = vector.load %arg3[%c0_1, %c0_2] : memref<24x32xf32, #tpu.memory_space<vmem>>, vector<24x32xf32>
    %cst = arith.constant dense<0.000000e+00> : vector<8x32xf32>
    %2 = tpu.matmul %0, %1, %cst {dimension_numbers = #tpu.dot_dimension_numbers<[1], [0], [0], [1], [0, 0, 1, 1], [], []>} : vector<8x24xf32>, vector<24x32xf32>, vector<8x32xf32> -> vector<8x32xf32>
    %c0_3 = arith.constant 0 : index
    %c0_4 = arith.constant 0 : index
    %3 = vector.load %arg2[%c0_3, %c0_4] : memref<8x8xf32, #tpu.memory_space<vmem>>, vector<8x8xf32>
    %c0_5 = arith.constant 0 : index
    %c0_6 = arith.constant 0 : index
    %4 = vector.load %arg4[%c0_5, %c0_6] : memref<8x32xf32, #tpu.memory_space<vmem>>, vector<8x32xf32>
    %cst_7 = arith.constant dense<0.000000e+00> : vector<8x32xf32>
    %5 = tpu.matmul %3, %4, %cst_7 {dimension_numbers = #tpu.dot_dimension_numbers<[1], [0], [0], [1], [0, 0, 1, 1], [], []>} : vector<8x8xf32>, vector<8x32xf32>, vector<8x32xf32> -> vector<8x32xf32>
    %6 = arith.addf %2, %5 : vector<8x32xf32>
    %c0_8 = arith.constant 0 : index
    %c0_9 = arith.constant 0 : index
    %7 = vector.load %arg5[%c0_8, %c0_9] : memref<1x32xf32, #tpu.memory_space<vmem>>, vector<1x32xf32>
    %8 = vector.broadcast %7 : vector<1x32xf32> to vector<8x32xf32>
    %9 = arith.addf %6, %8 : vector<8x32xf32>
    %cst_10 = arith.constant 0.000000e+00 : f32
    %10 = vector.broadcast %cst_10 : f32 to vector<8x32xf32>
    %11 = arith.maximumf %9, %10 : vector<8x32xf32>
    %c0_11 = arith.constant 0 : index
    %c0_12 = arith.constant 0 : index
    %12 = vector.load %arg6[%c0_11, %c0_12] : memref<32x32xf32, #tpu.memory_space<vmem>>, vector<32x32xf32>
    %cst_13 = arith.constant dense<0.000000e+00> : vector<8x32xf32>
    %13 = tpu.matmul %11, %12, %cst_13 {dimension_numbers = #tpu.dot_dimension_numbers<[1], [0], [0], [1], [0, 0, 1, 1], [], []>} : vector<8x32xf32>, vector<32x32xf32>, vector<8x32xf32> -> vector<8x32xf32>
    %c0_14 = arith.constant 0 : index
    %c0_15 = arith.constant 0 : index
    %14 = vector.load %arg7[%c0_14, %c0_15] : memref<1x32xf32, #tpu.memory_space<vmem>>, vector<1x32xf32>
    %15 = vector.broadcast %14 : vector<1x32xf32> to vector<8x32xf32>
    %16 = arith.addf %13, %15 : vector<8x32xf32>
    %cst_16 = arith.constant 0.000000e+00 : f32
    %17 = vector.broadcast %cst_16 : f32 to vector<8x32xf32>
    %18 = arith.maximumf %16, %17 : vector<8x32xf32>
    %c0_17 = arith.constant 0 : index
    %c0_18 = arith.constant 0 : index
    %19 = vector.load %arg8[%c0_17, %c0_18] : memref<1x32xf32, #tpu.memory_space<vmem>>, vector<1x32xf32>
    %20 = vector.broadcast %19 : vector<1x32xf32> to vector<8x32xf32>
    %21 = arith.mulf %18, %20 : vector<8x32xf32>
    %cst_19 = arith.constant dense<0.000000e+00> : vector<8xf32>
    %22 = vector.multi_reduction <add>, %21, %cst_19 [1] : vector<8x32xf32> to vector<8xf32>
    %23 = vector.shape_cast %22 : vector<8xf32> to vector<8x1xf32>
    %c0_20 = arith.constant 0 : index
    %24 = memref.load %arg9[%c0_20] : memref<1xf32, #tpu.memory_space<smem>>
    %25 = vector.broadcast %24 : f32 to vector<8x1xf32>
    %26 = arith.addf %23, %25 : vector<8x1xf32>
    %c0_21 = arith.constant 0 : index
    %c0_22 = arith.constant 0 : index
    %27 = vector.load %arg10[%c0_21, %c0_22] : memref<8x1xf32, #tpu.memory_space<vmem>>, vector<8x1xf32>
    tpu.vector_store %arg10[%c0_21, %c0_22], %26 {strides = array<i32>} : memref<8x1xf32, #tpu.memory_space<vmem>>, vector<8x1xf32>,
    return
  }
  func.func @transform_0(%arg0: i32) -> (i32, i32) {
    %c0_i32 = arith.constant 0 : i32
    %c0_i32_0 = arith.constant 0 : i32
    return %arg0, %c0_i32 : i32, i32
  }
  func.func @transform_1(%arg0: i32) -> (i32, i32) {
    %c0_i32 = arith.constant 0 : i32
    %c0_i32_0 = arith.constant 0 : i32
    return %arg0, %c0_i32 : i32, i32
  }
  func.func @transform_2(%arg0: i32) -> (i32, i32) {
    %c0_i32 = arith.constant 0 : i32
    %c0_i32_0 = arith.constant 0 : i32
    %c0_i32_1 = arith.constant 0 : i32
    return %c0_i32, %c0_i32_0 : i32, i32
  }
  func.func @transform_3(%arg0: i32) -> (i32, i32) {
    %c0_i32 = arith.constant 0 : i32
    %c0_i32_0 = arith.constant 0 : i32
    %c0_i32_1 = arith.constant 0 : i32
    return %c0_i32, %c0_i32_0 : i32, i32
  }
  func.func @transform_4(%arg0: i32) -> (i32, i32) {
    %c0_i32 = arith.constant 0 : i32
    %c0_i32_0 = arith.constant 0 : i32
    %c0_i32_1 = arith.constant 0 : i32
    return %c0_i32, %c0_i32_0 : i32, i32
  }
  func.func @transform_5(%arg0: i32) -> (i32, i32) {
    %c0_i32 = arith.constant 0 : i32
    %c0_i32_0 = arith.constant 0 : i32
    %c0_i32_1 = arith.constant 0 : i32
    return %c0_i32, %c0_i32_0 : i32, i32
  }
  func.func @transform_6(%arg0: i32) -> (i32, i32) {
    %c0_i32 = arith.constant 0 : i32
    %c0_i32_0 = arith.constant 0 : i32
    %c0_i32_1 = arith.constant 0 : i32
    return %c0_i32, %c0_i32_0 : i32, i32
  }
  func.func @transform_7(%arg0: i32) -> (i32, i32) {
    %c0_i32 = arith.constant 0 : i32
    %c0_i32_0 = arith.constant 0 : i32
    %c0_i32_1 = arith.constant 0 : i32
    return %c0_i32, %c0_i32_0 : i32, i32
  }
  func.func @transform_8(%arg0: i32) -> i32 {
    %c0_i32 = arith.constant 0 : i32
    %c0_i32_0 = arith.constant 0 : i32
    return %c0_i32 : i32
  }
  func.func @transform_9(%arg0: i32) -> (i32, i32) {
    %c0_i32 = arith.constant 0 : i32
    %c0_i32_0 = arith.constant 0 : i32
    return %arg0, %c0_i32 : i32, i32
  }
}

</mosaic_0001>

<bundles_post_ra>
// kernel: tpu_custom_call.1
= control target key start
LH: loop header
LB: loop body
LE: loop exit
PB: predicated region body
PF: predicated region fallthrough
CT: control target
= control target key end

     0   :  { %15 = vsyncpa [#allocation4], 0  ;;  %s635_s0 = inlined_call_operand.hbm [shape: f32[8,24], index: 0, kind: input, shape index: {}]   ;;  %s636_s1 = inlined_call_operand.hbm [shape: f32[8,8], index: 1, kind: input, shape index: {}]   ;;  %s637_s2 = inlined_call_operand.hbm [shape: f32[24,32], index: 2, kind: input, shape index: {}]   ;;  %s638_s3 = inlined_call_operand.vmem [shape: f32[8,32], index: 3, kind: input, shape index: {}]   ;;  %s639_s4 = inlined_call_operand.vmem [shape: f32[1,32], index: 4, kind: input, shape index: {}]   ;;  %s640_s5 = inlined_call_operand.hbm [shape: f32[32,32], index: 5, kind: input, shape index: {}]   ;;  %s641_s6 = inlined_call_operand.vmem [shape: f32[1,32], index: 6, kind: input, shape index: {}]   ;;  %s642_s7 = inlined_call_operand.vmem [shape: f32[1,32], index: 7, kind: input, shape index: {}]   ;;  %s643_s8 = inlined_call_operand.<no memory space> [shape: f32[1], index: 8, kind: input, shape index: {}]   ;;  %s644_s9 = inlined_call_operand.vmem [shape: f32[8,1], index: 9, kind: output, shape index: {}]  }
   0x1   :  { %16 = vsyncpa [#allocation6], 0 }
   0x2   :  { %17 = vsyncpa [#allocation9], 0  ;;  %s510_s30 = smov [#allocation5]   ;;  %s511_s11 = smov [#allocation3]  }
   0x3   :  { %s34_s10 = sshll.u32 %s510_s30, 4  ;;  %s24_s12 = sshll.u32 %s511_s11, 4  ;;  %s35_s10 = int_to_ptr.vmem [resolvable:$true] %s34_s10  ;;  %s25_s12 = int_to_ptr.vmem [resolvable:$true] %s24_s12 }
   0x4   :  { %s416_s15 = scalar_lea.hbm %s636_s1, 128 }
   0x5   :  { %p417_p0 = scmp.ne.s32.totalorder %s636_s1, %s416_s15  ;;  %p420_p1 = scmp.lt.u32.totalorder %s416_s15, %s636_s1 }
   0x7   :  { %p422_p2 = pnand %p420_p1, %p417_p0 }
   0x9   :  { %425 = shalt.err (!%p422_p2)
}
   0xa   :  { %s426_s20 = scalar_lea.vmem %s35_s10, 128  ;;  %p431_p4 = scmp.lt.s32.totalorder %s35_s10, %s35_s10 }
   0xb   :  { %p427_p3 = scmp.ne.s32.totalorder %s35_s10, %s426_s20  ;;  %p432_p5 = scmp.lt.s32.totalorder %s426_s20, %s426_s20 }
   0xd   :  { %p433_p6 = por %p432_p5, %p431_p4 }
   0xf   :  { %p434_p7 = pnand %p433_p6, %p427_p3 }
  0x11   :  { %437 = shalt.err (!%p434_p7)
}
  0x12   :  { %37 = dma.hbm_to_vmem [thread:$0]  %s636_s1, 128, %s35_s10, [#allocation6]  }
  0x13   :  { %s438_s25 = scalar_lea.hbm %s635_s0, 128 }
  0x14   :  { %p439_p8 = scmp.ne.s32.totalorder %s635_s0, %s438_s25  ;;  %p442_p9 = scmp.lt.u32.totalorder %s438_s25, %s635_s0 }
  0x16   :  { %p444_p10 = pnand %p442_p9, %p439_p8 }
  0x18   :  { %447 = shalt.err (!%p444_p10)
}
  0x19   :  { %s448_s30 = scalar_lea.vmem %s25_s12, 128  ;;  %p453_p12 = scmp.lt.s32.totalorder %s25_s12, %s25_s12 }
  0x1a   :  { %p449_p11 = scmp.ne.s32.totalorder %s25_s12, %s448_s30  ;;  %p454_p13 = scmp.lt.s32.totalorder %s448_s30, %s448_s30 }
  0x1c   :  { %p455_p0 = por %p454_p13, %p453_p12 }
  0x1e   :  { %p456_p1 = pnand %p455_p0, %p449_p11 }
  0x20   :  { %459 = shalt.err (!%p456_p1)
}
  0x21   :  { %27 = dma.hbm_to_vmem [thread:$0]  %s635_s0, 128, %s25_s12, [#allocation4]  }
  0x22   :  { %s512_s11 = smov [#allocation7]   ;;  %s460_s16 = scalar_lea.hbm %s637_s2, 384 }
  0x23   :  { %s43_s13 = sshll.u32 %s512_s11, 4  ;;  %p461_p2 = scmp.ne.s32.totalorder %s637_s2, %s460_s16  ;;  %s44_s13 = int_to_ptr.vmem [resolvable:$true] %s43_s13 }
  0x24   :  { %p464_p3 = scmp.lt.u32.totalorder %s460_s16, %s637_s2 }
  0x26   :  { %p466_p4 = pnand %p464_p3, %p461_p2 }
  0x28   :  { %469 = shalt.err (!%p466_p4)
}
  0x29   :  { %s470_s21 = scalar_lea.vmem %s44_s13, 384  ;;  %p475_p6 = scmp.lt.s32.totalorder %s44_s13, %s44_s13 }
  0x2a   :  { %p471_p5 = scmp.ne.s32.totalorder %s44_s13, %s470_s21  ;;  %p476_p7 = scmp.lt.s32.totalorder %s470_s21, %s470_s21 }
  0x2c   :  { %p477_p8 = por %p476_p7, %p475_p6 }
  0x2e   :  { %p478_p9 = pnand %p477_p8, %p471_p5 }
  0x30   :  { %481 = shalt.err (!%p478_p9)
}
  0x31   :  { %s513_s0 = smov 128   ;;  %s514_s12 = smov 8  }
  0x32   :  { %49 = dma.hbm_to_vmem [thread:$0]  %s637_s2, 384, %s44_s13, [#allocation6], %s513_s0, %s513_s0, %s514_s12  }
  0x33   :  { %s515_s24 = smov [#allocation8]   ;;  %s482_s28 = scalar_lea.hbm %s640_s5, 512 }
  0x34   :  { %s59_s25 = sshll.u32 %s515_s24, 4  ;;  %p483_p10 = scmp.ne.s32.totalorder %s640_s5, %s482_s28  ;;  %s60_s25 = int_to_ptr.vmem [resolvable:$true] %s59_s25 }
  0x35   :  { %p486_p11 = scmp.lt.u32.totalorder %s482_s28, %s640_s5 }
  0x37   :  { %p488_p12 = pnand %p486_p11, %p483_p10 }
  0x39   :  { %491 = shalt.err (!%p488_p12)
}
  0x3a   :  { %s492_s11 = scalar_lea.vmem %s60_s25, 512  ;;  %p497_p0 = scmp.lt.s32.totalorder %s60_s25, %s60_s25 }
  0x3b   :  { %p493_p13 = scmp.ne.s32.totalorder %s60_s25, %s492_s11  ;;  %p498_p1 = scmp.lt.s32.totalorder %s492_s11, %s492_s11 }
  0x3d   :  { %p499_p2 = por %p498_p1, %p497_p0 }
  0x3f   :  { %p500_p3 = pnand %p499_p2, %p493_p13 }
  0x41   :  { %503 = shalt.err (!%p500_p3)
}
  0x42   :  { %65 = dma.hbm_to_vmem [thread:$0]  %s640_s5, 512, %s60_s25, [#allocation9], %s513_s0, %s513_s0, %s514_s12  }
  0x43   :  { %504 = dma.done.wait [#allocation4], 128  }
  0x44   :  { %505 = vsyncadd [#allocation4], 4294967168 }
  0x45   :  { %506 = dma.done.wait [#allocation6], 512  }
  0x46   :  { %507 = vsyncadd [#allocation6], 4294966784 }
  0x47   :  { %508 = dma.done.wait [#allocation9], 512  }
  0x48   :  { %509 = vsyncadd [#allocation9], 4294966784  ;;  %v516_v0 = vmov 0.0   ;;  %vm517_vm0 = vmmov 0   ;;  %v518_v1 = vmov 0.0|0.0   ;;  %vm90_vm1 = vcmask 64512  }
  0x49   :  { %373 = vmatprep.subr.mxu1 %v516_v0  ;;  %375 = vmatprep.mubr.msk.f32.mxu1 %vm517_vm0, %v516_v0  ;;  %v89_v2 = vld [vmem:[%s638_s3] sm:$0xff]  ;;  %v88_v3 = vld [vmem:[#allocation5] sm:$0xff]  ;;  %v85_v4 = vld [vmem:[#allocation7] sm:$0xff]  ;;  %vm164_vm2 = vcmask 195584   ;;  %vm258_vm3 = vcmask 261120   ;;  %v345_v31 = vstv %s643_s8  ;;  %vm347_vm4 = vcmask 7168  }
  0x4a   :  { %401 = vmatprep.subr.bf16.mxu0 %v518_v1  ;;  %395 = vmatprep.mubr.msk.f32.mxu0 %vm517_vm0, %v516_v0  ;;  %v86_v5 = vld [vmem:[#allocation7 + $0x8] sm:$0xff]  ;;  %v87_v7 = vld [vmem:[#allocation7 + $0x10] sm:$0xff]  ;;  %v247_v9 = vld [vmem:[#allocation8] sm:$0xff] }
  0x4b   :  { %374 = vmatpush3.msra.mxu1 %v89_v2  ;;  %v399_v6 = vpack.c.bf16 %v86_v5, %v85_v4  ;;  %v84_v8 = vld [vmem:[#allocation3] sm:$0xff]  ;;  %v248_v10 = vld [vmem:[#allocation8 + $0x8] sm:$0xff]  ;;  %v249_v12 = vld [vmem:[#allocation8 + $0x10] sm:$0xff] }
  0x4c   :  { %376 = vmatmul.mubr.msk.f32.vlgmr.msra.gmra.mrb[0].mxu1 %vm90_vm1, %v88_v3  ;;  %398 = vmatprep.subr.bf16.mxu1 %v518_v1  ;;  %v402_v11 = vpack.c.bf16 %v248_v10, %v247_v9  ;;  %v250_v13 = vld [vmem:[#allocation8 + $0x18] sm:$0xff] }
  0x4d   :  { %384 = vmatprep.mubr.msk.f32.mxu1 %vm517_vm0, %v516_v0  ;;  %400 = vmatpush3.bf16.msra.mxu1 %v399_v6  ;;  %v405_v14 = vpack.c.bf16 %v250_v13, %v249_v12  ;;  %v358_v18 = vld [vmem:[%s639_s4] ss:$0 sm:$0xff] }
  0x4e   :  { %382 = vmatprep.subr.mxu1 %v516_v0  ;;  %403 = vmatpush3.bf16.msra.mxu0 %v402_v11  ;;  %v359_v23 = vld [vmem:[%s641_s6] ss:$0 sm:$0xff] }
  0x4f   :  { %404 = vmatprep.subr.bf16.mxu0 %v518_v1  ;;  %v361_v27 = vld [vmem:[%s642_s7] ss:$0 sm:$0xff] }
  0x51   :  { %383 = vmatpush3.msra.mxu1 %v87_v7 }
  0x52   :  { %385 = vmatmul.mubr.msk.f32.vlgmr.msra.gmra.mrb[2].mxu1 %vm164_vm2, %v84_v8  ;;  %406 = vmatpush3.bf16.msra.mxu0 %v405_v14 }
 0x11f   :  { %v160_v15 = vpop.f32.mrb[0].mxu1 }
 0x120   :  { %v377_v16 = vpop.f32.mrb[1].mxu1 }
 0x125   :  { %v234_v17 = vpop.f32.mrb[2].mxu1 }
 0x126   :  { %v235_v19 = vadd.f32 %v234_v17, %v160_v15  ;;  %v386_v20 = vpop.f32.mrb[3].mxu1 }
 0x128   :  { %v245_v21 = vadd.f32 %v358_v18, %v235_v19 }
 0x12a   :  { %v246_v22 = vmax.f32 %v245_v21, 0.0 }
 0x12c   :  { %396 = vmatmul.mubr.msk.f32.vlgmr.msra.gmra.mrb[0].mxu0 %vm258_vm3, %v246_v22 }
 0x1ff   :  { %v328_v24 = vpop.f32.mrb[0].mxu0 }
 0x200   :  { %v329_v25 = vadd.f32 %v359_v23, %v328_v24  ;;  %v397_v26 = vpop.f32.mrb[1].mxu0 }
 0x202   :  { %v332_v28 = vmax.f32 %v329_v25, 0.0 }
 0x204   :  { %v340_v29 = vmul.f32 %v361_v27, %v332_v28 }
 0x206   :  { %v341_v30 = vsel %vm258_vm3, %v340_v29, 0.0 }
 0x207   :  { %342 = vadd.xlane.f32.xlu0 %v341_v30 }
 0x294   :  { %v343_v32 = vpop.xlane.xlu0 %342 }
 0x295   :  { %v346_v33 = vadd.f32 %v345_v31, %v343_v32 }
 0x297   :  { %348 = vst.msk [vmem:[%s644_s9] sm:$0xff] %vm347_vm4, %v346_v33 }
 0x298   :  { %353 = vsyncpa [#allocation4], 1 }
 0x299   :  { %354 = vsyncpa [#allocation6], 1 }
 0x29a   :  { %355 = vsyncpa [#allocation9], 1 }

</bundles_post_ra>
